<compile_context>
chip_gen: v6e
topology: v6e:2x2x1
jax: 0.10.0
libtpu: 0.0.40
codegen_flags: <defaults>
</compile_context>

<pallas_src>
import functools

import jax
import jax.numpy as jnp
import numpy as np
from jax.experimental import pallas as pl
from jax.experimental.pallas import tpu as pltpu


def _masked_nll_kernel(*refs, divide, has_weight, n_rows, tile_n):
    if has_weight:
        pred_ref, target_ref, mask_ref, weight_ref, out_ref, num_acc, den_acc = refs
    else:
        pred_ref, target_ref, mask_ref, out_ref, num_acc, den_acc = refs
        weight_ref = None

    i = pl.program_id(0)

    @pl.when(i == 0)
    def _init():
        num_acc[...] = jnp.zeros_like(num_acc)
        den_acc[...] = jnp.zeros_like(den_acc)

    pred = pred_ref[...].astype(jnp.float32)     # (tn, c), upcast in-kernel only
    tgt = target_ref[...]                        # (tn, 1) int32
    msk = mask_ref[...]                          # (tn, 1) f32

    tn, c = pred.shape
    row_ids = jax.lax.broadcasted_iota(jnp.int32, (tn, c), 0)
    class_ids = jax.lax.broadcasted_iota(jnp.int32, (tn, c), 1)
    valid = (row_ids + i * tile_n) < n_rows      # mask out ragged-tile pad rows
    sel = (class_ids == tgt) & valid             # (tn, c) bool; select, no 0*(-inf)

    if has_weight:
        w = weight_ref[...].astype(jnp.float32)  # (1, c), resident across grid
        wm = w * msk                             # (tn, c) == w[class] * mask[row]
        num_acc[...] += -jnp.sum(jnp.where(sel, pred * wm, 0.0))
        if divide:
            den_acc[...] += jnp.sum(jnp.where(sel, wm, 0.0))
    else:
        num_acc[...] += -jnp.sum(jnp.where(sel, pred * msk, 0.0))
        if divide:
            # denominator == torch.sum(mask): plain column reduce over valid rows
            row_ids1 = jax.lax.broadcasted_iota(jnp.int32, (tn, 1), 0)
            valid_col = (row_ids1 + i * tile_n) < n_rows
            den_acc[...] += jnp.sum(jnp.where(valid_col, msk, 0.0))

    @pl.when(i == pl.num_programs(0) - 1)
    def _finalize():
        if divide:
            out_ref[...] = num_acc[...] / den_acc[...]
        else:
            out_ref[...] = num_acc[...]


def _choose_tile_n(n, c, itemsize):
    """Pick a row-tile: ~4 MiB of pred per buffer, multiple of the sublane pack."""
    sublane = {4: 8, 2: 16, 1: 32}.get(int(itemsize), 8)
    if n <= sublane:
        return n                                   # block == full dim is always legal
    target_bytes = 4 * 1024 * 1024
    tile = target_bytes // max(1, c * int(itemsize))
    tile = max(sublane, min(int(tile), n, 4096))
    return (tile // sublane) * sublane


def masked_nll_loss(pred, target, mask=None, weight=None):
    """Pallas implementation of MaskedNLLLoss.forward. pred stays in its native dtype."""
    n, c = pred.shape
    divide = mask is not None
    has_weight = weight is not None

    if mask is None:
        mask_col = jnp.ones((n, 1), jnp.float32)
    else:
        mask_col = mask.reshape(n, 1).astype(jnp.float32)
    target_col = target.reshape(n, 1).astype(jnp.int32)

    tile_n = _choose_tile_n(n, c, jnp.dtype(pred.dtype).itemsize)
    grid = (pl.cdiv(n, tile_n),)

    in_specs = [
        pl.BlockSpec((tile_n, c), lambda i: (i, 0)),   # pred tile (native dtype)
        pl.BlockSpec((tile_n, 1), lambda i: (i, 0)),   # target column
        pl.BlockSpec((tile_n, 1), lambda i: (i, 0)),   # mask column
    ]
    args = [pred, target_col, mask_col]
    if has_weight:
        in_specs.append(pl.BlockSpec((1, c), lambda i: (0, 0)))  # weight row, resident
        args.append(weight.reshape(1, c).astype(jnp.float32))

    kernel = functools.partial(
        _masked_nll_kernel,
        divide=divide,
        has_weight=has_weight,
        n_rows=n,
        tile_n=tile_n,
    )

    out = pl.pallas_call(
        kernel,
        out_shape=jax.ShapeDtypeStruct((1, 1), jnp.float32),
        grid=grid,
        in_specs=in_specs,
        out_specs=pl.BlockSpec((1, 1), lambda i: (0, 0)),
        scratch_shapes=[
            pltpu.VMEM((1, 1), jnp.float32),   # num accumulator
            pltpu.VMEM((1, 1), jnp.float32),   # den accumulator
        ],
        compiler_params=pltpu.CompilerParams(dimension_semantics=("arbitrary",)),
    )(*args)
    return out[0, 0]


def _reference(pred, target, mask=None, weight=None):
    """Pure-JAX reference mirroring the PyTorch module."""
    pred = pred.astype(jnp.float32)
    n, _ = pred.shape
    picked = pred[jnp.arange(n), target]
    if weight is None:
        w_t = jnp.ones((n,), pred.dtype)
    else:
        w_t = weight.astype(jnp.float32)[target]
    if mask is None:
        return jnp.sum(-w_t * picked)
    m = mask.reshape(-1).astype(pred.dtype)
    num = jnp.sum(-w_t * m * picked)
    den = jnp.sum(m) if weight is None else jnp.sum(w_t * m)
    return num / den


if __name__ == "__main__":
    batch, seq_len, n_classes = 2, 8, 4
    N = batch * seq_len

    key = jax.random.PRNGKey(0)
    k1, k2, k3 = jax.random.split(key, 3)

    logits = jax.random.normal(k1, (N, n_classes), jnp.float32)
    pred = jax.nn.log_softmax(logits, axis=-1)              # log-probs, as NLLLoss expects
    target = jax.random.randint(k2, (N,), 0, n_classes, jnp.int32)
    mask = (jax.random.uniform(k3, (batch, seq_len)) > 0.3).astype(jnp.float32)
    weight = jnp.arange(1, n_classes + 1, dtype=jnp.float32) * 0.25

    # case 1: mask given, weight=None (default module config)
    loss_no_w = masked_nll_loss(pred, target, mask=mask, weight=None)
    jax.block_until_ready(loss_no_w)
    np.testing.assert_allclose(
        np.asarray(loss_no_w), np.asarray(_reference(pred, target, mask, None)),
        rtol=1e-5, atol=1e-5)

    # case 2: mask and class weights
    loss_w = masked_nll_loss(pred, target, mask=mask, weight=weight)
    jax.block_until_ready(loss_w)
    np.testing.assert_allclose(
        np.asarray(loss_w), np.asarray(_reference(pred, target, mask, weight)),
        rtol=1e-5, atol=1e-5)

    # case 3: mask=None (plain sum NLL)
    loss_nm = masked_nll_loss(pred, target, mask=None, weight=None)
    jax.block_until_ready(loss_nm)
    np.testing.assert_allclose(
        np.asarray(loss_nm), np.asarray(_reference(pred, target, None, None)),
        rtol=1e-5, atol=1e-5)

    # case 4: bf16 pred streamed natively, upcast only inside the kernel
    pred_bf16 = pred.astype(jnp.bfloat16)
    loss_bf16 = masked_nll_loss(pred_bf16, target, mask=mask, weight=weight)
    jax.block_until_ready(loss_bf16)
    np.testing.assert_allclose(
        np.asarray(loss_bf16),
        np.asarray(_reference(pred_bf16.astype(jnp.float32), target, mask, weight)),
        rtol=1e-3, atol=1e-3)

    # case 5: multi-tile grid with a ragged last tile (N not a multiple of TILE_N)
    b2, s2, c2 = 12, 25, 10                                  # N = 300 rows
    N2 = b2 * s2
    kk1, kk2, kk3 = jax.random.split(jax.random.PRNGKey(1), 3)
    pred2 = jax.nn.log_softmax(jax.random.normal(kk1, (N2, c2), jnp.float32), axis=-1)
    target2 = jax.random.randint(kk2, (N2,), 0, c2, jnp.int32)
    mask2 = (jax.random.uniform(kk3, (b2, s2)) > 0.5).astype(jnp.float32)
    loss_big = masked_nll_loss(pred2, target2, mask=mask2, weight=None)
    jax.block_until_ready(loss_big)
    np.testing.assert_allclose(
        np.asarray(loss_big), np.asarray(_reference(pred2, target2, mask2, None)),
        rtol=1e-5, atol=1e-5)

    print("KERNEL_OK")
</pallas_src>

<mosaic_0001>
module attributes {stable_mosaic.version = 11 : i64} {
  func.func @_masked_nll_kernel(%arg0: i32, %arg1: memref<16x4xf32, #tpu.memory_space<vmem>>, %arg2: memref<16x1xi32, #tpu.memory_space<vmem>>, %arg3: memref<16x1xf32, #tpu.memory_space<vmem>>, %arg4: memref<1x1xf32, #tpu.memory_space<vmem>>, %arg5: memref<1x1xf32, #tpu.memory_space<vmem>>, %arg6: memref<1x1xf32, #tpu.memory_space<vmem>>) attributes {dimension_semantics = [#tpu.dimension_semantics<arbitrary>], iteration_bounds = array<i64: 1>, scalar_prefetch = 0 : i64, scratch_operands = 2 : i64, tpu.core_type = #tpu.core_type<tc>, window_params = [{transform_indices = @transform_0, window_bounds = array<i64: 16, 4>}, {transform_indices = @transform_1, window_bounds = array<i64: 16, 1>}, {transform_indices = @transform_2, window_bounds = array<i64: 16, 1>}, {pipeline_mode = #tpu.pipeline_mode<synchronous>, transform_indices = @transform_3, window_bounds = array<i64: 1, 1>}]} {
    %c0_i32 = arith.constant 0 : i32
    %0 = arith.cmpi eq, %arg0, %c0_i32 : i32
    %1 = arith.extui %0 : i1 to i32
    %c0_i32_0 = arith.constant 0 : i32
    %2 = arith.cmpi ne, %1, %c0_i32_0 : i32
    scf.if %2 {
      %cst_23 = arith.constant 0.000000e+00 : f32
      %48 = vector.broadcast %cst_23 : f32 to vector<1x1xf32>
      %c0_24 = arith.constant 0 : index
      %c0_25 = arith.constant 0 : index
      %49 = vector.load %arg5[%c0_24, %c0_25] : memref<1x1xf32, #tpu.memory_space<vmem>>, vector<1x1xf32>
      tpu.vector_store %arg5[%c0_24, %c0_25], %48 {strides = array<i32>} : memref<1x1xf32, #tpu.memory_space<vmem>>, vector<1x1xf32>,
      %cst_26 = arith.constant 0.000000e+00 : f32
      %50 = vector.broadcast %cst_26 : f32 to vector<1x1xf32>
      %c0_27 = arith.constant 0 : index
      %c0_28 = arith.constant 0 : index
      %51 = vector.load %arg6[%c0_27, %c0_28] : memref<1x1xf32, #tpu.memory_space<vmem>>, vector<1x1xf32>
      tpu.vector_store %arg6[%c0_27, %c0_28], %50 {strides = array<i32>} : memref<1x1xf32, #tpu.memory_space<vmem>>, vector<1x1xf32>,
    } else {
    }
    %c0 = arith.constant 0 : index
    %c0_1 = arith.constant 0 : index
    %3 = vector.load %arg1[%c0, %c0_1] : memref<16x4xf32, #tpu.memory_space<vmem>>, vector<16x4xf32>
    %c0_2 = arith.constant 0 : index
    %c0_3 = arith.constant 0 : index
    %4 = vector.load %arg2[%c0_2, %c0_3] : memref<16x1xi32, #tpu.memory_space<vmem>>, vector<16x1xi32>
    %c0_4 = arith.constant 0 : index
    %c0_5 = arith.constant 0 : index
    %5 = vector.load %arg3[%c0_4, %c0_5] : memref<16x1xf32, #tpu.memory_space<vmem>>, vector<16x1xf32>
    %6 = tpu.iota {dimensions = array<i32: 0>} : vector<16x4xi32>
    %7 = tpu.iota {dimensions = array<i32: 1>} : vector<16x4xi32>
    %c16_i32 = arith.constant 16 : i32
    %8 = arith.muli %arg0, %c16_i32 : i32
    %9 = vector.broadcast %8 : i32 to vector<16x4xi32>
    %10 = arith.addi %6, %9 : vector<16x4xi32>
    %c16_i32_6 = arith.constant 16 : i32
    %11 = vector.broadcast %c16_i32_6 : i32 to vector<16x4xi32>
    %12 = arith.cmpi slt, %10, %11 : vector<16x4xi32>
    %13 = vector.broadcast %4 : vector<16x1xi32> to vector<16x4xi32>
    %14 = arith.cmpi eq, %7, %13 : vector<16x4xi32>
    %15 = arith.andi %14, %12 : vector<16x4xi1>
    %c0_7 = arith.constant 0 : index
    %c0_8 = arith.constant 0 : index
    %16 = vector.load %arg5[%c0_7, %c0_8] : memref<1x1xf32, #tpu.memory_space<vmem>>, vector<1x1xf32>
    %17 = vector.broadcast %5 : vector<16x1xf32> to vector<16x4xf32>
    %18 = arith.mulf %3, %17 : vector<16x4xf32>
    %cst = arith.constant 0.000000e+00 : f32
    %19 = vector.broadcast %cst : f32 to vector<16x4xf32>
    %20 = arith.select %15, %18, %19 : vector<16x4xi1>, vector<16x4xf32>
    %21 = vector.shape_cast %20 : vector<16x4xf32> to vector<1x16x4xf32>
    %cst_9 = arith.constant dense<0.000000e+00> : vector<1xf32>
    %22 = vector.multi_reduction <add>, %21, %cst_9 [1, 2] : vector<1x16x4xf32> to vector<1xf32>
    %23 = vector.shape_cast %22 : vector<1xf32> to vector<1x1x1xf32>
    %24 = vector.extract %23[0, 0, 0] : f32 from vector<1x1x1xf32>
    %cst_10 = arith.constant 0.000000e+00 : f32
    %25 = arith.subf %cst_10, %24 : f32
    %26 = vector.broadcast %25 : f32 to vector<1x1xf32>
    %27 = arith.addf %16, %26 : vector<1x1xf32>
    %c0_11 = arith.constant 0 : index
    %c0_12 = arith.constant 0 : index
    %28 = vector.load %arg5[%c0_11, %c0_12] : memref<1x1xf32, #tpu.memory_space<vmem>>, vector<1x1xf32>
    tpu.vector_store %arg5[%c0_11, %c0_12], %27 {strides = array<i32>} : memref<1x1xf32, #tpu.memory_space<vmem>>, vector<1x1xf32>,
    %29 = tpu.iota {dimensions = array<i32: 0>} : vector<16x1xi32>
    %c16_i32_13 = arith.constant 16 : i32
    %30 = arith.muli %arg0, %c16_i32_13 : i32
    %31 = vector.broadcast %30 : i32 to vector<16x1xi32>
    %32 = arith.addi %29, %31 : vector<16x1xi32>
    %c16_i32_14 = arith.constant 16 : i32
    %33 = vector.broadcast %c16_i32_14 : i32 to vector<16x1xi32>
    %34 = arith.cmpi slt, %32, %33 : vector<16x1xi32>
    %c0_15 = arith.constant 0 : index
    %c0_16 = arith.constant 0 : index
    %35 = vector.load %arg6[%c0_15, %c0_16] : memref<1x1xf32, #tpu.memory_space<vmem>>, vector<1x1xf32>
    %cst_17 = arith.constant 0.000000e+00 : f32
    %36 = vector.broadcast %cst_17 : f32 to vector<16x1xf32>
    %37 = arith.select %34, %5, %36 : vector<16x1xi1>, vector<16x1xf32>
    %38 = vector.shape_cast %37 : vector<16x1xf32> to vector<1x16x1xf32>
    %cst_18 = arith.constant dense<0.000000e+00> : vector<1xf32>
    %39 = vector.multi_reduction <add>, %38, %cst_18 [1, 2] : vector<1x16x1xf32> to vector<1xf32>
    %40 = vector.shape_cast %39 : vector<1xf32> to vector<1x1x1xf32>
    %41 = vector.extract %40[0, 0, 0] : f32 from vector<1x1x1xf32>
    %42 = vector.broadcast %41 : f32 to vector<1x1xf32>
    %43 = arith.addf %35, %42 : vector<1x1xf32>
    %c0_19 = arith.constant 0 : index
    %c0_20 = arith.constant 0 : index
    %44 = vector.load %arg6[%c0_19, %c0_20] : memref<1x1xf32, #tpu.memory_space<vmem>>, vector<1x1xf32>
    tpu.vector_store %arg6[%c0_19, %c0_20], %43 {strides = array<i32>} : memref<1x1xf32, #tpu.memory_space<vmem>>, vector<1x1xf32>,
    %c0_i32_21 = arith.constant 0 : i32
    %45 = arith.cmpi eq, %arg0, %c0_i32_21 : i32
    %46 = arith.extui %45 : i1 to i32
    %c0_i32_22 = arith.constant 0 : i32
    %47 = arith.cmpi ne, %46, %c0_i32_22 : i32
    scf.if %47 {
      %c0_23 = arith.constant 0 : index
      %c0_24 = arith.constant 0 : index
      %48 = vector.load %arg5[%c0_23, %c0_24] : memref<1x1xf32, #tpu.memory_space<vmem>>, vector<1x1xf32>
      %c0_25 = arith.constant 0 : index
      %c0_26 = arith.constant 0 : index
      %49 = vector.load %arg6[%c0_25, %c0_26] : memref<1x1xf32, #tpu.memory_space<vmem>>, vector<1x1xf32>
      %50 = arith.divf %48, %49 : vector<1x1xf32>
      %c0_27 = arith.constant 0 : index
      %c0_28 = arith.constant 0 : index
      %51 = vector.load %arg4[%c0_27, %c0_28] : memref<1x1xf32, #tpu.memory_space<vmem>>, vector<1x1xf32>
      tpu.vector_store %arg4[%c0_27, %c0_28], %50 {strides = array<i32>} : memref<1x1xf32, #tpu.memory_space<vmem>>, vector<1x1xf32>,
    } else {
    }
    return
  }
  func.func @transform_0(%arg0: i32) -> (i32, i32) {
    %c0_i32 = arith.constant 0 : i32
    %c0_i32_0 = arith.constant 0 : i32
    return %arg0, %c0_i32 : i32, i32
  }
  func.func @transform_1(%arg0: i32) -> (i32, i32) {
    %c0_i32 = arith.constant 0 : i32
    %c0_i32_0 = arith.constant 0 : i32
    return %arg0, %c0_i32 : i32, i32
  }
  func.func @transform_2(%arg0: i32) -> (i32, i32) {
    %c0_i32 = arith.constant 0 : i32
    %c0_i32_0 = arith.constant 0 : i32
    return %arg0, %c0_i32 : i32, i32
  }
  func.func @transform_3(%arg0: i32) -> (i32, i32) {
    %c0_i32 = arith.constant 0 : i32
    %c0_i32_0 = arith.constant 0 : i32
    %c0_i32_1 = arith.constant 0 : i32
    return %c0_i32, %c0_i32_0 : i32, i32
  }
}

</mosaic_0001>

<bundles_post_ra>
// kernel: tpu_custom_call.1
= control target key start
LH: loop header
LB: loop body
LE: loop exit
PB: predicated region body
PF: predicated region fallthrough
CT: control target
= control target key end

     0   :  { %v156_v2 = vmov 0   ;;  %s205_s0 = inlined_call_operand.vmem [shape: f32[16,4], index: 0, kind: input, shape index: {}]   ;;  %s206_s1 = inlined_call_operand.vmem [shape: s32[16,1], index: 1, kind: input, shape index: {}]   ;;  %s207_s2 = inlined_call_operand.vmem [shape: f32[16,1], index: 2, kind: input, shape index: {}]   ;;  %s208_s3 = inlined_call_operand.hbm [shape: f32[1,1], index: 3, kind: output, shape index: {}]  }
   0x1   :  { %v26_v0 = vld [vmem:[%s207_s2] sm:$0xff]  ;;  %131 = vset.pattern.permute.xlu1 %v156_v2  ;;  %130 = vset.pattern.permute.xlu0 %v156_v2 }
   0x2   :  { %v24_v1 = vld [vmem:[%s206_s1] sm:$0xff]  ;;  %52 = vperm.xlu0 %130, %v26_v0  }
   0x3   :  { %40 = vperm.xlu1 %131, %v24_v1  }
   0x4   :  { %8 = vsyncpa [#allocation5], 0  ;;  %v27_v3 = vld [vmem:[%s207_s2 + $0x8] sm:$0xff]  ;;  %vm85_vm0 = vcmask 7168   ;;  %v31_v8 = vlaneseq  ;;  %v22_v9 = vld [vmem:[%s205_s0] sm:$0xff]  ;;  %vm64_vm3 = vcmask 31744  }
   0x5   :  { %v25_v4 = vld [vmem:[%s206_s1 + $0x8] sm:$0xff]  ;;  %v86_v5 = vsel %vm85_vm0, %v26_v0, 0.0  ;;  %v87_v6 = vsel %vm85_vm0, %v27_v3, 0.0  ;;  %vm19_vm4 = vcmask 0   ;;  %v157_v23 = vmov 0.0   ;;  %s158_s24 = smov [#allocation4]  }
   0x6   :  { %57 = vperm.xlu0 %130, %v27_v3   ;;  %v88_v7 = vadd.f32 %v87_v6, %v86_v5  ;;  %v32_v10 = vand.u32 127, %v31_v8  ;;  %v23_v14 = vld [vmem:[%s205_s0 + $0x8] sm:$0xff]  ;;  %20 = vst.msk [vmem:[#allocation2] sm:$0x1] %vm19_vm4, %v157_v23  ;;  %21 = vst.msk [vmem:[#allocation3] sm:$0x1] %vm19_vm4, %v157_v23 }
   0x7   :  { %43 = vperm.xlu1 %131, %v25_v4   ;;  %s115_s25 = sshll.u32 %s158_s24, 4  ;;  %s116_s25 = int_to_ptr.vmem [resolvable:$true] %s115_s25 }
   0x8   :  { %s134_s26 = scalar_lea.vmem %s116_s25, 16  ;;  %s138_s27 = scalar_lea.vmem %s116_s25, 32 }
   0x9   :  { %p135_p0 = scmp.ne.s32.totalorder %s116_s25, %s134_s26  ;;  %p139_p1 = scmp.lt.s32.totalorder %s116_s25, %s116_s25 }
   0xa   :  { %p140_p2 = scmp.lt.s32.totalorder %s138_s27, %s134_s26 }
   0xc   :  { %p141_p3 = por %p140_p2, %p139_p1 }
   0xd   :  { %v82_v38 = vld [vmem:[#allocation3] sm:$0x1]  ;;  %v49_v39 = vld [vmem:[#allocation2] sm:$0x1] }
   0xe   :  { %p142_p4 = pnand %p141_p3, %p135_p0 }
  0x2b   :  { %89 = vadd.xlane.f32.xlu1 %v88_v7 }
  0x7d   :  { %v53_v11 = vpop.permute.xlu0 %52 }
  0x7e   :  { %v41_v12 = vpop.permute.xlu1 %40  ;;  %v60_v13 = vmul.f32 %v53_v11, %v22_v9 }
  0x7f   :  { %vm45_vm1 = vcmp.eq.s32.totalorder %v32_v10, %v41_v12 }
  0x80   :  { %v62_v17 = vsel %vm45_vm1, %v60_v13, 0.0 }
  0x81   :  { %v58_v15 = vpop.permute.xlu0 %57  ;;  %v65_v20 = vsel %vm64_vm3, %v62_v17, 0.0 }
  0x82   :  { %v44_v16 = vpop.permute.xlu1 %43  ;;  %v61_v18 = vmul.f32 %v58_v15, %v23_v14 }
  0x83   :  { %vm46_vm2 = vcmp.eq.s32.totalorder %v32_v10, %v44_v16 }
  0x84   :  { %v63_v19 = vsel %vm46_vm2, %v61_v18, 0.0 }
  0x85   :  { %v66_v21 = vsel %vm64_vm3, %v63_v19, 0.0 }
  0x86   :  { %v67_v22 = vadd.f32 %v66_v21, %v65_v20 }
  0x88   :  { %68 = vadd.xlane.f32.xlu0 %v67_v22 }
  0xb4   :  { %v90_v24 = vpop.xlane.xlu1 %89 }
  0xb5   :  { %v91_v25 = vrot.slane %v90_v24, 4 }
  0xb7   :  { %v92_v26 = vadd.f32 %v91_v25, %v90_v24 }
  0xb9   :  { %v93_v27 = vrot.slane %v92_v26, 2 }
  0xbb   :  { %v94_v31 = vadd.f32 %v93_v27, %v92_v26 }
  0xbd   :  { %v95_v34 = vrot.slane %v94_v31, 1 }
  0xbf   :  { %v96_v37 = vadd.f32 %v95_v34, %v94_v31 }
 0x111   :  { %v69_v28 = vpop.xlane.xlu0 %68 }
 0x112   :  { %v70_v29 = vrot.slane %v69_v28, 4 }
 0x114   :  { %v71_v30 = vadd.f32 %v70_v29, %v69_v28 }
 0x116   :  { %v72_v32 = vrot.slane %v71_v30, 2 }
 0x118   :  { %v73_v33 = vadd.f32 %v72_v32, %v71_v30 }
 0x11a   :  { %v74_v35 = vrot.slane %v73_v33, 1 }
 0x11c   :  { %v75_v36 = vadd.f32 %v74_v35, %v73_v33 }
 0x11e   :  { %123 = vpush %v75_v36 }
 0x11f   :  { %125 = vpush %v96_v37 }
 0x14f   :  { %s124_s0 = spop %123 }
 0x150   :  { %s77_s1 = ssub.f32 0.0, %s124_s0  ;;  %s126_s23 = spop %125 }
 0x151   :  { %v98_v40 = vstv %s126_s23 }
 0x152   :  { %v78_v41 = vstv %s77_s1  ;;  %v99_v42 = vadd.f32 %v98_v40, %v82_v38 }
 0x153   :  { %v79_v43 = vadd.f32 %v78_v41, %v49_v39 }
 0x154   :  { %100 = vst.msk [vmem:[#allocation3] sm:$0x1] %vm19_vm4, %v99_v42 }
 0x155   :  { %81 = vst.msk [vmem:[#allocation2] sm:$0x1] %vm19_vm4, %v79_v43 }
 0x15b   :  { %v105_v44 = vld [vmem:[#allocation3] sm:$0x1] }
 0x15c   :  { %132 = vrcp.f32 %v105_v44  ;;  %v104_v46 = vld [vmem:[#allocation2] sm:$0x1] }
 0x169   :  { %v133_v45 = vpop.eup %132 }
 0x16a   :  { %v107_v47 = vmul.f32 %v133_v45, %v104_v46 }
 0x16c   :  { %108 = vst.msk [vmem:[#allocation4] sm:$0x1] %vm19_vm4, %v107_v47 }
 0x16d   :  { %145 = shalt.err (!%p142_p4)
}
 0x16e   :  { %118 = dma.vmem_to_hbm [thread:$0]  %s116_s25, 16, %s208_s3, [#allocation5]  }
 0x16f   :  { %154 = dma.done.wait [#allocation5], 16  }
 0x170   :  { %155 = vsyncadd [#allocation5], 4294967280 }
 0x171   :  { %122 = vsyncpa [#allocation5], 1 }

</bundles_post_ra>
